<compile_context>
chip_gen: v7x
topology: tpu7x:2x2x1
jax: 0.10.0
libtpu: 0.0.40
codegen_flags: <defaults>
</compile_context>

<pallas_src>
import math
import functools

import numpy as np
import jax
import jax.numpy as jnp
from jax.experimental import pallas as pl
from jax.experimental.pallas import tpu as pltpu


# ----------------------------------------------------------------------------
# Parameter / buffer construction (deterministic, mirrors torch __init__)
# ----------------------------------------------------------------------------
def make_positional_encoding(d_model: int, seq_len: int) -> jnp.ndarray:
    """Builds the (seq_len, d_model) sinusoidal PE buffer exactly like the torch code."""
    assert d_model % 2 == 0, "d_model must be even (same limitation as the torch original)"
    position = jnp.arange(0, seq_len, dtype=jnp.float32)[:, None]            # (S, 1)
    div_term = jnp.exp(
        jnp.arange(0, d_model, 2, dtype=jnp.float32) * (-math.log(10000.0) / d_model)
    )                                                                         # (D/2,)
    angles = position * div_term                                              # (S, D/2)
    pe = jnp.zeros((seq_len, d_model), dtype=jnp.float32)
    pe = pe.at[:, 0::2].set(jnp.sin(angles))
    pe = pe.at[:, 1::2].set(jnp.cos(angles))
    return pe


# ----------------------------------------------------------------------------
# Kernels (operate on lane-dense flattened blocks)
# ----------------------------------------------------------------------------
def _pe_add_kernel(x_ref, pe_ref, o_ref):
    # x_ref: (B, TILE) block; pe_ref: (1, TILE) block broadcast over batch rows.
    o_ref[...] = x_ref[...] + pe_ref[...]


def _pe_add_dropout_kernel(x_ref, pe_ref, bits_ref, o_ref, *, threshold, scale):
    # Inverted dropout via integer threshold compare on raw uint32 bits.
    y = x_ref[...] + pe_ref[...]
    keep = bits_ref[...] >= threshold                       # P(keep) ~= 1 - rate
    o_ref[...] = jnp.where(keep, y * scale, jnp.zeros_like(y))


# ----------------------------------------------------------------------------
# Tiling helper: largest multiple-of-128 divisor of n whose (rows, tile) block
# stays under ~target_bytes. Falls back to the full axis if n % 128 != 0.
# ----------------------------------------------------------------------------
def _pick_lane_tile(n: int, block_rows: int, itemsize: int,
                    target_bytes: int = 2 * 1024 * 1024) -> int:
    if n % 128 != 0:
        return n  # full-extent block is always legal (handles small/unaligned demo shapes)
    row_bytes = max(1, block_rows * itemsize)
    max_elems = max(128, target_bytes // row_bytes)
    best = 128
    m = n // 128
    for k in range(1, m + 1):
        if m % k == 0:
            cand = 128 * k
            if cand <= max_elems:
                best = cand
            else:
                break
    return best


# ----------------------------------------------------------------------------
# Wrapper
# ----------------------------------------------------------------------------
def positional_encoding_forward(x, pe, *, dropout_rate=0.0, training=False, rng_key=None):
    """x: (B, S, D); pe: (S_max, D).  Returns dropout(x + pe[:S])."""
    b, s, d = x.shape
    n = s * d

    # Glue (plain JAX): slice pe to S, pre-cast to x.dtype, flatten (S, D) -> lane axis.
    pe_flat = pe[:s, :].astype(x.dtype).reshape(1, n)
    x_flat = x.reshape(b, n)

    tile = _pick_lane_tile(n, b, jnp.dtype(x.dtype).itemsize)
    grid = (n // tile,)

    x_spec = pl.BlockSpec((b, tile), lambda i: (0, i))     # full batch, tiled lane axis
    pe_spec = pl.BlockSpec((1, tile), lambda i: (0, i))    # fetched once per tile
    out_spec = pl.BlockSpec((b, tile), lambda i: (0, i))
    out_shape = jax.ShapeDtypeStruct((b, n), x.dtype)

    cparams = pltpu.CompilerParams(
        dimension_semantics=("parallel",),                 # independent blocks -> both v7x TCs
        vmem_limit_bytes=32 * 1024 * 1024,
    )

    if (not training) or dropout_rate == 0.0:
        out = pl.pallas_call(
            _pe_add_kernel,
            out_shape=out_shape,
            grid=grid,
            in_specs=[x_spec, pe_spec],
            out_specs=out_spec,
            compiler_params=cparams,
        )(x_flat, pe_flat)
        return out.reshape(b, s, d)

    # Training mode: inverted dropout. Random bits come from a proper JAX PRNG key
    # (no additive seed collisions across batch/layers).
    # TODO(synk): the mask cannot bit-match torch.nn.Dropout's RNG stream; on real TPU
    # hardware the bits could instead be drawn in-kernel with pltpu.prng_random_bits
    # to avoid streaming the mask from HBM.
    if rng_key is None:
        rng_key = jax.random.PRNGKey(0)
    bits = jax.random.bits(rng_key, (b, n), dtype=jnp.uint32)

    threshold = np.uint32(min(int(round(float(dropout_rate) * (1 << 32))), (1 << 32) - 1))
    scale = 1.0 / (1.0 - float(dropout_rate))
    kernel = functools.partial(_pe_add_dropout_kernel, threshold=threshold, scale=scale)

    bits_spec = pl.BlockSpec((b, tile), lambda i: (0, i))
    out = pl.pallas_call(
        kernel,
        out_shape=out_shape,
        grid=grid,
        in_specs=[x_spec, pe_spec, bits_spec],
        out_specs=out_spec,
        compiler_params=cparams,
    )(x_flat, pe_flat, bits)
    return out.reshape(b, s, d)


# ----------------------------------------------------------------------------
# Demo / self-test
# ----------------------------------------------------------------------------
if __name__ == "__main__":
    d_model = 32
    seq_len_max = 16
    seq_len = 8
    batch = 2
    dropout_rate = 0.1

    key = jax.random.PRNGKey(0)
    k_x, k_drop = jax.random.split(key)
    x = jax.random.normal(k_x, (batch, seq_len, d_model), dtype=jnp.float32)
    pe = make_positional_encoding(d_model, seq_len_max)

    # Eval mode (dropout = identity): must match x + pe.
    out_eval = positional_encoding_forward(
        x, pe, dropout_rate=dropout_rate, training=False)
    out_eval = jax.block_until_ready(out_eval)
    ref = x + pe[None, :seq_len, :]
    assert out_eval.shape == (batch, seq_len, d_model)
    assert jnp.allclose(out_eval, ref, atol=1e-6), "eval-mode mismatch"

    # Train mode: every output element must be either 0 (dropped) or ref / (1 - rate).
    out_train = positional_encoding_forward(
        x, pe, dropout_rate=dropout_rate, training=True, rng_key=k_drop)
    out_train = jax.block_until_ready(out_train)
    assert out_train.shape == (batch, seq_len, d_model)
    scaled = ref / (1.0 - dropout_rate)
    ok = jnp.isclose(out_train, 0.0, atol=1e-6) | jnp.isclose(out_train, scaled, atol=1e-5)
    assert bool(jnp.all(ok)), "train-mode dropout mismatch"

    print("KERNEL_OK")
</pallas_src>

<mosaic_0001>
module attributes {stable_mosaic.version = 11 : i64} {
  func.func @_pe_add_kernel(%arg0: i32, %arg1: memref<2x256xf32, #tpu.memory_space<vmem>>, %arg2: memref<1x256xf32, #tpu.memory_space<vmem>>, %arg3: memref<2x256xf32, #tpu.memory_space<vmem>>) attributes {dimension_semantics = [#tpu.dimension_semantics<parallel>], iteration_bounds = array<i64: 1>, scalar_prefetch = 0 : i64, scratch_operands = 0 : i64, tpu.core_type = #tpu.core_type<tc>, window_params = [{transform_indices = @transform_0, window_bounds = array<i64: 2, 256>}, {transform_indices = @transform_1, window_bounds = array<i64: 1, 256>}, {transform_indices = @transform_2, window_bounds = array<i64: 2, 256>}]} {
    %c0 = arith.constant 0 : index
    %c0_0 = arith.constant 0 : index
    %0 = vector.load %arg1[%c0, %c0_0] : memref<2x256xf32, #tpu.memory_space<vmem>>, vector<2x256xf32>
    %c0_1 = arith.constant 0 : index
    %c0_2 = arith.constant 0 : index
    %1 = vector.load %arg2[%c0_1, %c0_2] : memref<1x256xf32, #tpu.memory_space<vmem>>, vector<1x256xf32>
    %2 = vector.broadcast %1 : vector<1x256xf32> to vector<2x256xf32>
    %3 = arith.addf %0, %2 : vector<2x256xf32>
    %c0_3 = arith.constant 0 : index
    %c0_4 = arith.constant 0 : index
    %4 = vector.load %arg3[%c0_3, %c0_4] : memref<2x256xf32, #tpu.memory_space<vmem>>, vector<2x256xf32>
    tpu.vector_store %arg3[%c0_3, %c0_4], %3 {strides = array<i32>} : memref<2x256xf32, #tpu.memory_space<vmem>>, vector<2x256xf32>,
    return
  }
  func.func @transform_0(%arg0: i32) -> (i32, i32) {
    %c0_i32 = arith.constant 0 : i32
    %c0_i32_0 = arith.constant 0 : i32
    return %c0_i32, %arg0 : i32, i32
  }
  func.func @transform_1(%arg0: i32) -> (i32, i32) {
    %c0_i32 = arith.constant 0 : i32
    %c0_i32_0 = arith.constant 0 : i32
    return %c0_i32, %arg0 : i32, i32
  }
  func.func @transform_2(%arg0: i32) -> (i32, i32) {
    %c0_i32 = arith.constant 0 : i32
    %c0_i32_0 = arith.constant 0 : i32
    return %c0_i32, %arg0 : i32, i32
  }
}

</mosaic_0001>

<bundles_post_ra>
// kernel: tpu_custom_call.1
= control target key start
LH: loop header
LB: loop body
LE: loop exit
PB: predicated region body
PF: predicated region fallthrough
CT: control target
= control target key end

     0   :  { %7 = vsyncpa [#allocation3], 0  ;;  %s157_s0 = inlined_call_operand.hbm [shape: f32[2,256], index: 0, kind: input, shape index: {}]   ;;  %s158_s1 = inlined_call_operand.vmem [shape: f32[1,256], index: 1, kind: input, shape index: {}]   ;;  %s159_s2 = inlined_call_operand.hbm [shape: f32[2,256], index: 2, kind: output, shape index: {}]  }
   0x1   :  { %8 = vsyncpa [#allocation4], 0  ;;  %s112_s9 = smov [#allocation2]   ;;  %s64_s13 = scalar_lea.hbm %s157_s0, 64 }
   0x2   :  { %s15_s10 = sshll.u32 %s112_s9, 4  ;;  %p65_p0 = scmp.ne.s32.totalorder %s157_s0, %s64_s13  ;;  %s16_s10 = int_to_ptr.vmem [resolvable:$true] %s15_s10 }
   0x3   :  { %p68_p1 = scmp.lt.u32.totalorder %s64_s13, %s157_s0 }
   0x5   :  { %p70_p2 = pnand %p68_p1, %p65_p0 }
   0x7   :  { %73 = shalt.err (!%p70_p2)
}
   0x8   :  { %s74_s18 = scalar_lea.vmem %s16_s10, 64  ;;  %p79_p4 = scmp.lt.s32.totalorder %s16_s10, %s16_s10 }
   0x9   :  { %p75_p3 = scmp.ne.s32.totalorder %s16_s10, %s74_s18  ;;  %p80_p5 = scmp.lt.s32.totalorder %s74_s18, %s74_s18 }
   0xb   :  { %p81_p6 = por %p80_p5, %p79_p4 }
   0xd   :  { %p82_p7 = pnand %p81_p6, %p75_p3 }
   0xf   :  { %85 = shalt.err (!%p82_p7)
}
  0x10   :  { %18 = dma.hbm_to_vmem [thread:$0]  %s157_s0, 64, %s16_s10, [#allocation3]  }
  0x11   :  { %108 = dma.done.wait [#allocation3], 64  }
  0x12   :  { %109 = vsyncadd [#allocation3], 4294967232  ;;  %v27_v0 = vlaneseq  ;;  %v113_v1 = vmov 1983009808   ;;  %v25_v7 = vld [vmem:[%s158_s1] sm:$0x3] }
  0x13   :  { %v37_v2 = vunpack.c.l.s4 %v113_v1  ;;  %v24_v12 = vld [vmem:[#allocation2] sm:$0xf]  ;;  %s114_s23 = smov [#allocation5]  }
  0x14   :  { %v28_v3 = vshrl.u32 %v27_v0, 7  ;;  %s52_s0 = sshll.u32 %s114_s23, 4  ;;  %s53_s0 = int_to_ptr.vmem [resolvable:$true] %s52_s0 }
  0x15   :  { %v38_v6 = vunpack.c.0.s8 %v37_v2  ;;  %s86_s24 = scalar_lea.vmem %s53_s0, 64  ;;  %p91_p9 = scmp.lt.s32.totalorder %s53_s0, %s53_s0 }
  0x16   :  { %v29_v4 = vsub.s32 0, %v28_v3  ;;  %v33_v5 = vsub.s32 1, %v28_v3  ;;  %p87_p8 = scmp.ne.s32.totalorder %s53_s0, %s86_s24  ;;  %p92_p10 = scmp.lt.s32.totalorder %s86_s24, %s86_s24 }
  0x17   :  { %v41_v10 = vsub.s32 %v38_v6, %v28_v3 }
  0x18   :  { %v30_v8 = vrot.slane %v25_v7, %v29_v4  ;;  %v34_v9 = vrot.slane %v25_v7, %v33_v5  ;;  %p93_p11 = por %p92_p10, %p91_p9 }
  0x1a   :  { %v35_v11 = vcombine.low %v30_v8, %v34_v9  ;;  %p94_p12 = pnand %p93_p11, %p87_p8 }
  0x1c   :  { %v42_v13 = vrot.slane %v35_v11, %v41_v10 }
  0x1e   :  { %v44_v14 = vadd.f32 %v42_v13, %v24_v12 }
  0x20   :  { %45 = vst [vmem:[#allocation5] sm:$0xf] %v44_v14 }
  0x21   :  { %97 = shalt.err (!%p94_p12)
}
  0x22   :  { %s98_s26 = scalar_lea.hbm %s159_s2, 64 }
  0x23   :  { %p99_p13 = scmp.ne.s32.totalorder %s159_s2, %s98_s26  ;;  %p102_p0 = scmp.lt.u32.totalorder %s98_s26, %s159_s2 }
  0x25   :  { %p104_p1 = pnand %p102_p0, %p99_p13 }
  0x27   :  { %107 = shalt.err (!%p104_p1)
}
  0x28   :  { %55 = dma.vmem_to_hbm [thread:$0]  %s53_s0, 64, %s159_s2, [#allocation4]  }
  0x29   :  { %110 = dma.done.wait [#allocation4], 64  }
  0x2a   :  { %111 = vsyncadd [#allocation4], 4294967232 }
  0x2b   :  { %59 = vsyncpa [#allocation3], 1 }
  0x2c   :  { %60 = vsyncpa [#allocation4], 1 }

</bundles_post_ra>
